<compile_context>
chip_gen: v5e
topology: v5e:2x2
jax: 0.10.0
libtpu: 0.0.40
codegen_flags: <defaults>
</compile_context>

<pallas_src>
import math

import numpy as np
import jax
import jax.numpy as jnp
from jax.experimental import pallas as pl
from jax.experimental.pallas import tpu as pltpu

TILE_N = 512                         # active-voxel rows per grid step (>=512 amortizes per-step overhead)
VMEM_LIMIT_BYTES = 48 * 1024 * 1024  # explicit scoped-VMEM cap, safe on v5e/v6e/v7x (64 MiB phys on v7x)


# ----------------------------------------------------------------------------
# Pallas kernel: one fused GEMM  (TILE_N, Kc) @ (Kc, Cout)  ->  + bias  ->  ReLU
# Kc = K*Cin (padded to a multiple of 128).  BN scale is pre-folded into W, so
# the epilogue is a single VPU add + max.
# ----------------------------------------------------------------------------
def _gemm_bias_relu_kernel(x_ref, w_ref, b_ref, o_ref):
    acc = jnp.dot(x_ref[...], w_ref[...], preferred_element_type=jnp.float32)
    o_ref[...] = jnp.maximum(acc + b_ref[...], 0.0).astype(o_ref.dtype)


def fused_gemm_bias_relu(x, w, bias):
    """x: (M_pad, Kc) bf16, w: (Kc, Cout) bf16, bias: (1, Cout) f32 -> (M_pad, Cout) f32."""
    m_pad, kc = x.shape
    cout = w.shape[1]
    assert m_pad % TILE_N == 0 and kc % 128 == 0
    grid = (m_pad // TILE_N,)
    flops = 2 * m_pad * kc * cout
    bytes_accessed = m_pad * kc * 2 + kc * cout * 2 + m_pad * cout * 4 + cout * 4
    return pl.pallas_call(
        _gemm_bias_relu_kernel,
        out_shape=jax.ShapeDtypeStruct((m_pad, cout), jnp.float32),
        grid_spec=pltpu.PrefetchScalarGridSpec(
            num_scalar_prefetch=0,
            grid=grid,
            in_specs=[
                pl.BlockSpec((TILE_N, kc), lambda i: (i, 0)),     # gathered X tile
                pl.BlockSpec((kc, cout), lambda i: (0, 0)),       # weights stay resident
                pl.BlockSpec((1, cout), lambda i: (0, 0)),        # folded BN bias
            ],
            out_specs=pl.BlockSpec((TILE_N, cout), lambda i: (i, 0)),
        ),
        compiler_params=pltpu.CompilerParams(
            dimension_semantics=("parallel",),
            vmem_limit_bytes=VMEM_LIMIT_BYTES,
        ),
        cost_estimate=pl.CostEstimate(
            flops=int(flops), transcendentals=0, bytes_accessed=int(bytes_accessed)),
    )(x, w, bias)


# ----------------------------------------------------------------------------
# Host-side rulebook construction (spconv SubMConv3d / SparseConv3d semantics).
# Sorted linear keys + searchsorted; no dense occupancy grid.
# ----------------------------------------------------------------------------
def _to3(v):
    if isinstance(v, (tuple, list)):
        return tuple(int(x) for x in v)
    return (int(v),) * 3


def _pad_taps(K, cin):
    """Smallest Kp >= K such that Kp*cin is a multiple of 128 (lane-aligned contraction)."""
    step = 128 // math.gcd(cin, 128)
    return -(-K // step) * step


def _lookup(sorted_keys, order, query_keys, valid):
    if sorted_keys.size == 0:
        return np.full(query_keys.shape, -1, dtype=np.int64)
    pos = np.searchsorted(sorted_keys, query_keys)
    pos_c = np.minimum(pos, sorted_keys.size - 1)
    found = valid & (sorted_keys[pos_c] == query_keys)
    return np.where(found, order[pos_c], -1)


def build_subm_rules(coords, spatial_shape, kernel):
    """SubMConv3d: output coords == input coords; gather centered neighbors."""
    kd, kh, kw = _to3(kernel)
    pd, ph, pw = kd // 2, kh // 2, kw // 2
    D, H, W = spatial_shape
    N = coords.shape[0]
    b = coords[:, 0].astype(np.int64)
    keys = ((b * D + coords[:, 1]) * H + coords[:, 2]) * W + coords[:, 3]
    order = np.argsort(keys, kind="stable")
    skeys = keys[order]

    K = kd * kh * kw
    gather = np.empty((N, K), dtype=np.int64)
    t = 0
    for dz in range(kd):
        for dy in range(kh):
            for dx in range(kw):
                nz = coords[:, 1] - pd + dz
                ny = coords[:, 2] - ph + dy
                nx = coords[:, 3] - pw + dx
                valid = ((nz >= 0) & (nz < D) & (ny >= 0) & (ny < H)
                         & (nx >= 0) & (nx < W))
                qk = ((b * D + nz) * H + ny) * W + nx
                gather[:, t] = _lookup(skeys, order, qk, valid)
                t += 1
    return gather, coords, tuple(spatial_shape)


def build_spconv_rules(coords, spatial_shape, kernel, stride, padding):
    """SparseConv3d: output active wherever its receptive field covers an active input."""
    kd, kh, kw = _to3(kernel)
    sd, sh, sw = _to3(stride)
    pd, ph, pw = _to3(padding)
    D, H, W = spatial_shape
    Do = (D + 2 * pd - kd) // sd + 1
    Ho = (H + 2 * ph - kh) // sh + 1
    Wo = (W + 2 * pw - kw) // sw + 1

    b = coords[:, 0].astype(np.int64)
    in_keys = ((b * D + coords[:, 1]) * H + coords[:, 2]) * W + coords[:, 3]
    order = np.argsort(in_keys, kind="stable")
    skeys = in_keys[order]

    # Output occupancy: collect candidate output cells from every input voxel.
    cand = []
    for dz in range(kd):
        for dy in range(kh):
            for dx in range(kw):
                nz = coords[:, 1] + pd - dz
                ny = coords[:, 2] + ph - dy
                nx = coords[:, 3] + pw - dx
                ok = (nz % sd == 0) & (ny % sh == 0) & (nx % sw == 0)
                oz, oy, ox = nz // sd, ny // sh, nx // sw
                ok &= ((oz >= 0) & (oz < Do) & (oy >= 0) & (oy < Ho)
                       & (ox >= 0) & (ox < Wo))
                cand.append(((b[ok] * Do + oz[ok]) * Ho + oy[ok]) * Wo + ox[ok])
    out_keys = (np.unique(np.concatenate(cand)) if cand
                else np.empty((0,), np.int64))
    M = out_keys.shape[0]
    ob = out_keys // (Do * Ho * Wo)
    rem = out_keys % (Do * Ho * Wo)
    oz = rem // (Ho * Wo)
    rem = rem % (Ho * Wo)
    oy = rem // Wo
    ox = rem % Wo
    out_coords = np.stack([ob, oz, oy, ox], axis=1).astype(np.int64)

    K = kd * kh * kw
    gather = np.empty((M, K), dtype=np.int64)
    t = 0
    for dz in range(kd):
        for dy in range(kh):
            for dx in range(kw):
                iz = out_coords[:, 1] * sd - pd + dz
                iy = out_coords[:, 2] * sh - ph + dy
                ix = out_coords[:, 3] * sw - pw + dx
                valid = ((iz >= 0) & (iz < D) & (iy >= 0) & (iy < H)
                         & (ix >= 0) & (ix < W))
                qk = ((out_coords[:, 0] * D + iz) * H + iy) * W + ix
                gather[:, t] = _lookup(skeys, order, qk, valid)
                t += 1
    return gather, out_coords, (Do, Ho, Wo)


# ----------------------------------------------------------------------------
# One sparse conv + BN + ReLU layer: flattened gather (XLA) + fused GEMM (Pallas).
# ----------------------------------------------------------------------------
def _bucket_rows(m):
    """Pad rows to power-of-two buckets of TILE_N to avoid per-frame recompiles."""
    nb = max(1, -(-m // TILE_N))
    nb = 1 << (nb - 1).bit_length()
    return nb * TILE_N


def apply_layer(features, gather_np, w_flat, bias, k_pad):
    """features: (N_in, Cin) f32, gather_np: (M, K) int64 (-1 = missing),
    w_flat: (Kp*Cin, Cout) bf16, bias: (1, Cout) f32 -> (M, Cout) f32."""
    M, K = gather_np.shape
    N_in, cin = features.shape
    m_pad = _bucket_rows(M)

    # Build padded flat gather index: missing taps / padded taps / padded rows
    # all point at the appended zero row (index N_in).
    gidx = np.full((m_pad, k_pad), N_in, dtype=np.int32)
    gidx[:M, :K] = np.where(gather_np < 0, N_in, gather_np)

    feat_ext = jnp.concatenate(
        [features.astype(jnp.bfloat16), jnp.zeros((1, cin), jnp.bfloat16)], axis=0)
    x_flat = jnp.take(feat_ext, jnp.asarray(gidx.reshape(-1)), axis=0)
    x_flat = x_flat.reshape(m_pad, k_pad * cin)          # (M_pad, Kc) bf16, lane-dense

    out = fused_gemm_bias_relu(x_flat, w_flat, bias)
    return out[:M]                                       # drop padded garbage rows


# ----------------------------------------------------------------------------
# Parameters (deterministic synthetic init, BN folded) and model definition.
# ----------------------------------------------------------------------------
def make_layer_params(key, kernel, cin, cout):
    kd, kh, kw = _to3(kernel)
    K = kd * kh * kw
    kp = _pad_taps(K, cin)
    k1, k2, k3 = jax.random.split(key, 3)
    w = jax.random.normal(k1, (K, cin, cout), jnp.float32) / np.sqrt(K * cin)
    gamma = 1.0 + 0.1 * jax.random.normal(k2, (cout,), jnp.float32)
    beta = 0.1 * jax.random.normal(k3, (cout,), jnp.float32)
    eps = 1e-3
    running_mean = jnp.zeros((cout,), jnp.float32)
    running_var = jnp.ones((cout,), jnp.float32)
    scale = gamma / jnp.sqrt(running_var + eps)
    bias = beta - running_mean * scale
    # Fold BN scale into the conv weights, flatten taps into the contraction
    # dim (tap-major, cin-minor — matches the gather layout), zero-pad taps.
    w_fold = w * scale[None, None, :]
    w_flat = w_fold.reshape(K * cin, cout)
    w_flat = jnp.pad(w_flat, ((0, (kp - K) * cin), (0, 0)))
    return dict(w=w_flat.astype(jnp.bfloat16), bias=bias.reshape(1, cout),
                k=K, kp=kp)


class VoxelBackBone8xPallas:
    def __init__(self, input_channels, grid_size, key):
        grid_size = np.asarray(grid_size)
        self.sparse_shape = tuple((grid_size[::-1] + np.array([1, 0, 0])).tolist())
        # (name, [(conv_type, cin, cout, kernel, stride, padding), ...])
        cfg = [
            ("conv_input", [("subm", input_channels, 16, 3, 1, 1)]),
            ("conv1", [("subm", 16, 16, 3, 1, 1)]),
            ("conv2", [("spconv", 16, 32, 3, 2, 1),
                       ("subm", 32, 32, 3, 1, 1),
                       ("subm", 32, 32, 3, 1, 1)]),
            ("conv3", [("spconv", 32, 64, 3, 2, 1),
                       ("subm", 64, 64, 3, 1, 1),
                       ("subm", 64, 64, 3, 1, 1)]),
            ("conv4", [("spconv", 64, 64, 3, 2, (0, 1, 1)),
                       ("subm", 64, 64, 3, 1, 1),
                       ("subm", 64, 64, 3, 1, 1)]),
            ("conv_out", [("spconv", 64, 128, (3, 1, 1), (2, 1, 1), 0)]),
        ]
        self.cfg = cfg
        self.params = {}
        keys = jax.random.split(key, sum(len(b) for _, b in cfg))
        ki = 0
        for name, block in cfg:
            plist = []
            for (_, cin, cout, kernel, _, _) in block:
                plist.append(make_layer_params(keys[ki], kernel, cin, cout))
                ki += 1
            self.params[name] = plist
        self.num_point_features = 128

    def _run_block(self, name, feats, coords, shape):
        _, block = next(b for b in self.cfg if b[0] == name)
        for (ctype, cin, cout, kernel, stride, padding), p in zip(
                block, self.params[name]):
            if ctype == "subm":
                gather, coords, shape = build_subm_rules(coords, shape, kernel)
            else:
                gather, coords, shape = build_spconv_rules(
                    coords, shape, kernel, stride, padding)
            feats = apply_layer(feats, gather, p["w"], p["bias"], p["kp"])
        return feats, coords, shape

    def forward(self, batch_dict):
        feats = batch_dict["voxel_features"]
        coords = np.asarray(batch_dict["voxel_coords"], dtype=np.int64)
        shape = self.sparse_shape

        feats, coords, shape = self._run_block("conv_input", feats, coords, shape)
        x1_f, x1_c, x1_s = self._run_block("conv1", feats, coords, shape)
        x2_f, x2_c, x2_s = self._run_block("conv2", x1_f, x1_c, x1_s)
        x3_f, x3_c, x3_s = self._run_block("conv3", x2_f, x2_c, x2_s)
        x4_f, x4_c, x4_s = self._run_block("conv4", x3_f, x3_c, x3_s)
        out_f, out_c, out_s = self._run_block("conv_out", x4_f, x4_c, x4_s)

        batch_dict.update({
            "encoded_spconv_tensor": {"features": out_f, "indices": out_c,
                                      "spatial_shape": out_s},
            "encoded_spconv_tensor_stride": 8,
            "multi_scale_3d_features": {
                "x_conv1": {"features": x1_f, "indices": x1_c, "spatial_shape": x1_s},
                "x_conv2": {"features": x2_f, "indices": x2_c, "spatial_shape": x2_s},
                "x_conv3": {"features": x3_f, "indices": x3_c, "spatial_shape": x3_s},
                "x_conv4": {"features": x4_f, "indices": x4_c, "spatial_shape": x4_s},
            },
        })
        return batch_dict


# ----------------------------------------------------------------------------
# Example run.
# ----------------------------------------------------------------------------
if __name__ == "__main__":
    key = jax.random.PRNGKey(0)
    k_coords, k_feats, k_params = jax.random.split(key, 3)

    batch_size = 2
    input_channels = 4
    grid_size = [16, 16, 40]                 # [x, y, z] -> sparse_shape [41, 16, 16]
    num_voxels = 256

    D, H, W = 41, 16, 16                     # sparse_shape (z, y, x)
    total_cells = batch_size * D * H * W
    lin = jax.random.choice(k_coords, total_cells, shape=(num_voxels,), replace=False)
    lin = np.asarray(lin, dtype=np.int64)
    b = lin // (D * H * W)
    rem = lin % (D * H * W)
    z = rem // (H * W)
    rem = rem % (H * W)
    y = rem // W
    x = rem % W
    voxel_coords = np.stack([b, z, y, x], axis=1).astype(np.int64)   # (256, 4)
    voxel_features = jax.random.normal(k_feats, (num_voxels, input_channels),
                                       dtype=jnp.float32)

    model = VoxelBackBone8xPallas(input_channels, grid_size, k_params)
    batch_dict = {
        "batch_size": batch_size,
        "voxel_features": voxel_features,
        "voxel_coords": voxel_coords,
    }
    out = model.forward(batch_dict)
    enc = out["encoded_spconv_tensor"]["features"]
    jax.block_until_ready(enc)
    for name in ["x_conv1", "x_conv2", "x_conv3", "x_conv4"]:
        jax.block_until_ready(out["multi_scale_3d_features"][name]["features"])
    print("KERNEL_OK")
</pallas_src>

<mosaic_0001>
module attributes {stable_mosaic.version = 11 : i64} {
  func.func @_gemm_bias_relu_kernel(%arg0: i32, %arg1: memref<512x128xbf16, #tpu.memory_space<vmem>>, %arg2: memref<128x16xbf16, #tpu.memory_space<vmem>>, %arg3: memref<1x16xf32, #tpu.memory_space<vmem>>, %arg4: memref<512x16xf32, #tpu.memory_space<vmem>>) attributes {dimension_semantics = [#tpu.dimension_semantics<parallel>], iteration_bounds = array<i64: 1>, scalar_prefetch = 0 : i64, scratch_operands = 0 : i64, tpu.core_type = #tpu.core_type<tc>, window_params = [{transform_indices = @transform_0, window_bounds = array<i64: 512, 128>}, {pipeline_mode = #tpu.pipeline_mode<synchronous>, transform_indices = @transform_1, window_bounds = array<i64: 128, 16>}, {pipeline_mode = #tpu.pipeline_mode<synchronous>, transform_indices = @transform_2, window_bounds = array<i64: 1, 16>}, {transform_indices = @transform_3, window_bounds = array<i64: 512, 16>}]} {
    %c0 = arith.constant 0 : index
    %c0_0 = arith.constant 0 : index
    %0 = vector.load %arg1[%c0, %c0_0] : memref<512x128xbf16, #tpu.memory_space<vmem>>, vector<512x128xbf16>
    %c0_1 = arith.constant 0 : index
    %c0_2 = arith.constant 0 : index
    %1 = vector.load %arg2[%c0_1, %c0_2] : memref<128x16xbf16, #tpu.memory_space<vmem>>, vector<128x16xbf16>
    %cst = arith.constant dense<0.000000e+00> : vector<512x16xf32>
    %2 = tpu.matmul %0, %1, %cst {dimension_numbers = #tpu.dot_dimension_numbers<[1], [0], [0], [1], [0, 0, 1, 1], [], []>} : vector<512x128xbf16>, vector<128x16xbf16>, vector<512x16xf32> -> vector<512x16xf32>
    %c0_3 = arith.constant 0 : index
    %c0_4 = arith.constant 0 : index
    %3 = vector.load %arg3[%c0_3, %c0_4] : memref<1x16xf32, #tpu.memory_space<vmem>>, vector<1x16xf32>
    %4 = vector.broadcast %3 : vector<1x16xf32> to vector<512x16xf32>
    %5 = arith.addf %2, %4 : vector<512x16xf32>
    %cst_5 = arith.constant 0.000000e+00 : f32
    %6 = vector.broadcast %cst_5 : f32 to vector<512x16xf32>
    %7 = arith.maximumf %5, %6 : vector<512x16xf32>
    %c0_6 = arith.constant 0 : index
    %c0_7 = arith.constant 0 : index
    %8 = vector.load %arg4[%c0_6, %c0_7] : memref<512x16xf32, #tpu.memory_space<vmem>>, vector<512x16xf32>
    tpu.vector_store %arg4[%c0_6, %c0_7], %7 {strides = array<i32>} : memref<512x16xf32, #tpu.memory_space<vmem>>, vector<512x16xf32>,
    return
  }
  func.func @transform_0(%arg0: i32) -> (i32, i32) {
    %c0_i32 = arith.constant 0 : i32
    %c0_i32_0 = arith.constant 0 : i32
    return %arg0, %c0_i32 : i32, i32
  }
  func.func @transform_1(%arg0: i32) -> (i32, i32) {
    %c0_i32 = arith.constant 0 : i32
    %c0_i32_0 = arith.constant 0 : i32
    %c0_i32_1 = arith.constant 0 : i32
    return %c0_i32, %c0_i32_0 : i32, i32
  }
  func.func @transform_2(%arg0: i32) -> (i32, i32) {
    %c0_i32 = arith.constant 0 : i32
    %c0_i32_0 = arith.constant 0 : i32
    %c0_i32_1 = arith.constant 0 : i32
    return %c0_i32, %c0_i32_0 : i32, i32
  }
  func.func @transform_3(%arg0: i32) -> (i32, i32) {
    %c0_i32 = arith.constant 0 : i32
    %c0_i32_0 = arith.constant 0 : i32
    return %arg0, %c0_i32 : i32, i32
  }
}

</mosaic_0001>

<bundles_post_ra>
// kernel: tpu_custom_call.1
= control target key start
LH: loop header
LB: loop body
LE: loop exit
PB: predicated region body
PF: predicated region fallthrough
CT: control target
= control target key end

     0   :  { %8 = vsyncpa [#allocation3], 0  ;;  %s911_s15 = smov [#allocation2]   ;;  %s912_s17 = smov 64   ;;  %s1286_s0 = inlined_call_operand.hbm [shape: bf16[512,128], index: 0, kind: input, shape index: {}]   ;;  %s1287_s1 = inlined_call_operand.vmem [shape: bf16[128,16], index: 1, kind: input, shape index: {}]   ;;  %s1288_s2 = inlined_call_operand.vmem [shape: f32[1,16], index: 2, kind: input, shape index: {}]   ;;  %s1289_s3 = inlined_call_operand.vmem [shape: f32[512,16], index: 3, kind: output, shape index: {}]  }
   0x1   :  { %s13_s14 = sshll.u32 %s1286_s0, 4  ;;  %s15_s16 = sshll.u32 %s911_s15, 4  ;;  %s14_s14 = int_to_ptr.hbm [resolvable:$true] %s13_s14  ;;  %s16_s16 = int_to_ptr.vmem [resolvable:$true] %s15_s16 }
   0x2   :  { %s913_s18 = smov 4  }
   0x3   :  { %21 = dma.hbm_to_vmem [thread:$0]  %s14_s14, 4096, %s16_s16, [#allocation3], %s912_s17, %s912_s17, %s913_s18  }
   0x4   :  { %909 = dma.done.wait [#allocation3], 4096  }
   0x5   :  { %910 = vsyncadd [#allocation3], 4294963200  ;;  %v856_v0 = vld [vmem:[%s1287_s1 + $0x38] sm:$0xff]  ;;  %v855_v1 = vld [vmem:[%s1287_s1 + $0x30] sm:$0xff]  ;;  %vm587_vm0 = vcmask 130048  }
   0x6   :  { %354 = vmatpush.bf16.msra.mxu0 %v856_v0  ;;  %857 = vmatpush.bf16.msra.mxu1 %v856_v0  ;;  %v854_v2 = vld [vmem:[%s1287_s1 + $0x28] sm:$0xff]  ;;  %v853_v3 = vld [vmem:[%s1287_s1 + $0x20] sm:$0xff]  ;;  %v852_v4 = vld [vmem:[%s1287_s1 + $0x18] sm:$0xff] }
   0x7   :  { %858 = vmatpush.bf16.msra.mxu2 %v856_v0  ;;  %859 = vmatpush.bf16.msra.mxu3 %v856_v0  ;;  %v851_v5 = vld [vmem:[%s1287_s1 + $0x10] sm:$0xff]  ;;  %v850_v6 = vld [vmem:[%s1287_s1 + $0x8] sm:$0xff]  ;;  %v849_v7 = vld [vmem:[%s1287_s1] sm:$0xff] }
   0x8   :  { %v817_v8 = vld [vmem:[#allocation2] sm:$0xff]  ;;  %v818_v12 = vld [vmem:[#allocation2 + $0x8] sm:$0xff]  ;;  %v819_v16 = vld [vmem:[#allocation2 + $0x10] sm:$0xff] }
   0x9   :  { %v825_v9 = vld [vmem:[#allocation2 + $0x40] sm:$0xff]  ;;  %v826_v13 = vld [vmem:[#allocation2 + $0x48] sm:$0xff]  ;;  %v827_v17 = vld [vmem:[#allocation2 + $0x50] sm:$0xff] }
   0xa   :  { %355 = vmatpush.bf16.msra.mxu0 %v855_v1  ;;  %860 = vmatpush.bf16.msra.mxu1 %v855_v1  ;;  %v833_v10 = vld [vmem:[#allocation2 + $0x80] sm:$0xff]  ;;  %v834_v14 = vld [vmem:[#allocation2 + $0x88] sm:$0xff]  ;;  %v835_v18 = vld [vmem:[#allocation2 + $0x90] sm:$0xff] }
   0xb   :  { %861 = vmatpush.bf16.msra.mxu2 %v855_v1  ;;  %862 = vmatpush.bf16.msra.mxu3 %v855_v1  ;;  %v841_v11 = vld [vmem:[#allocation2 + $0xc0] sm:$0xff]  ;;  %v842_v15 = vld [vmem:[#allocation2 + $0xc8] sm:$0xff]  ;;  %v843_v19 = vld [vmem:[#allocation2 + $0xd0] sm:$0xff] }
   0xc   :  { %v820_v20 = vld [vmem:[#allocation2 + $0x18] sm:$0xff]  ;;  %v821_v24 = vld [vmem:[#allocation2 + $0x20] sm:$0xff]  ;;  %v822_v28 = vld [vmem:[#allocation2 + $0x28] sm:$0xff] }
   0xd   :  { %v828_v21 = vld [vmem:[#allocation2 + $0x58] sm:$0xff]  ;;  %v829_v25 = vld [vmem:[#allocation2 + $0x60] sm:$0xff]  ;;  %v830_v29 = vld [vmem:[#allocation2 + $0x68] sm:$0xff] }
   0xe   :  { %356 = vmatpush.bf16.msra.mxu0 %v854_v2  ;;  %863 = vmatpush.bf16.msra.mxu1 %v854_v2  ;;  %v836_v22 = vld [vmem:[#allocation2 + $0x98] sm:$0xff]  ;;  %v837_v26 = vld [vmem:[#allocation2 + $0xa0] sm:$0xff]  ;;  %v838_v30 = vld [vmem:[#allocation2 + $0xa8] sm:$0xff] }
   0xf   :  { %864 = vmatpush.bf16.msra.mxu2 %v854_v2  ;;  %865 = vmatpush.bf16.msra.mxu3 %v854_v2  ;;  %v844_v23 = vld [vmem:[#allocation2 + $0xd8] sm:$0xff]  ;;  %v845_v27 = vld [vmem:[#allocation2 + $0xe0] sm:$0xff]  ;;  %v846_v31 = vld [vmem:[#allocation2 + $0xe8] sm:$0xff] }
  0x10   :  { %v823_v32 = vld [vmem:[#allocation2 + $0x30] sm:$0xff]  ;;  %v824_v36 = vld [vmem:[#allocation2 + $0x38] sm:$0xff]  ;;  %v964_v40 = vld [vmem:[%s1288_s2] ss:$0 sm:$0xff] }
  0x11   :  { %v831_v33 = vld [vmem:[#allocation2 + $0x70] sm:$0xff]  ;;  %v832_v37 = vld [vmem:[#allocation2 + $0x78] sm:$0xff] }
  0x12   :  { %357 = vmatpush.bf16.msra.mxu0 %v853_v3  ;;  %866 = vmatpush.bf16.msra.mxu1 %v853_v3  ;;  %v839_v34 = vld [vmem:[#allocation2 + $0xb0] sm:$0xff]  ;;  %v840_v38 = vld [vmem:[#allocation2 + $0xb8] sm:$0xff] }
  0x13   :  { %867 = vmatpush.bf16.msra.mxu2 %v853_v3  ;;  %868 = vmatpush.bf16.msra.mxu3 %v853_v3  ;;  %v847_v35 = vld [vmem:[#allocation2 + $0xf0] sm:$0xff]  ;;  %v848_v39 = vld [vmem:[#allocation2 + $0xf8] sm:$0xff] }
  0x16   :  { %358 = vmatpush.bf16.msra.mxu0 %v852_v4  ;;  %869 = vmatpush.bf16.msra.mxu1 %v852_v4 }
  0x17   :  { %870 = vmatpush.bf16.msra.mxu2 %v852_v4  ;;  %871 = vmatpush.bf16.msra.mxu3 %v852_v4 }
  0x1a   :  { %359 = vmatpush.bf16.msra.mxu0 %v851_v5  ;;  %872 = vmatpush.bf16.msra.mxu1 %v851_v5 }
  0x1b   :  { %873 = vmatpush.bf16.msra.mxu2 %v851_v5  ;;  %874 = vmatpush.bf16.msra.mxu3 %v851_v5 }
  0x1e   :  { %360 = vmatpush.bf16.msra.mxu0 %v850_v6  ;;  %875 = vmatpush.bf16.msra.mxu1 %v850_v6 }
  0x1f   :  { %876 = vmatpush.bf16.msra.mxu2 %v850_v6  ;;  %877 = vmatpush.bf16.msra.mxu3 %v850_v6 }
  0x22   :  { %361 = vmatpush.bf16.msra.mxu0 %v849_v7  ;;  %878 = vmatpush.bf16.msra.mxu1 %v849_v7 }
  0x23   :  { %879 = vmatpush.bf16.msra.mxu2 %v849_v7  ;;  %880 = vmatpush.bf16.msra.mxu3 %v849_v7 }
  0x25   :  { %362 = vmatmul.bf16.vlgmr.msra.gmra.mxu0 %v817_v8  ;;  %402 = vmatmul.bf16.vlgmr.msra.gmra.mxu1 %v825_v9 }
  0x26   :  { %442 = vmatmul.bf16.vlgmr.msra.gmra.mxu2 %v833_v10  ;;  %482 = vmatmul.bf16.vlgmr.msra.gmra.mxu3 %v841_v11 }
  0x35   :  { %367 = vmatmul.bf16.gmra.mxu0 %v818_v12  ;;  %407 = vmatmul.bf16.gmra.mxu1 %v826_v13 }
  0x36   :  { %447 = vmatmul.bf16.gmra.mxu2 %v834_v14  ;;  %487 = vmatmul.bf16.gmra.mxu3 %v842_v15 }
  0x45   :  { %372 = vmatmul.bf16.gmra.mxu0 %v819_v16  ;;  %412 = vmatmul.bf16.gmra.mxu1 %v827_v17 }
  0x46   :  { %452 = vmatmul.bf16.gmra.mxu2 %v835_v18  ;;  %492 = vmatmul.bf16.gmra.mxu3 %v843_v19 }
  0x55   :  { %377 = vmatmul.bf16.gmra.mxu0 %v820_v20  ;;  %417 = vmatmul.bf16.gmra.mxu1 %v828_v21 }
  0x56   :  { %457 = vmatmul.bf16.gmra.mxu2 %v836_v22  ;;  %497 = vmatmul.bf16.gmra.mxu3 %v844_v23 }
  0x65   :  { %382 = vmatmul.bf16.gmra.mxu0 %v821_v24  ;;  %422 = vmatmul.bf16.gmra.mxu1 %v829_v25 }
  0x66   :  { %462 = vmatmul.bf16.gmra.mxu2 %v837_v26  ;;  %502 = vmatmul.bf16.gmra.mxu3 %v845_v27 }
  0x75   :  { %387 = vmatmul.bf16.gmra.mxu0 %v822_v28  ;;  %427 = vmatmul.bf16.gmra.mxu1 %v830_v29 }
  0x76   :  { %467 = vmatmul.bf16.gmra.mxu2 %v838_v30  ;;  %507 = vmatmul.bf16.gmra.mxu3 %v846_v31 }
  0x85   :  { %392 = vmatmul.bf16.gmra.mxu0 %v823_v32  ;;  %432 = vmatmul.bf16.gmra.mxu1 %v831_v33 }
  0x86   :  { %472 = vmatmul.bf16.gmra.mxu2 %v839_v34  ;;  %512 = vmatmul.bf16.gmra.mxu3 %v847_v35 }
  0x95   :  { %397 = vmatmul.bf16.gmra.mxu0 %v824_v36  ;;  %437 = vmatmul.bf16.gmra.mxu1 %v832_v37 }
  0x96   :  { %477 = vmatmul.bf16.gmra.mxu2 %v840_v38  ;;  %517 = vmatmul.bf16.gmra.mxu3 %v848_v39 }
  0xa2   :  { %v363_v41 = vpop.f32.mrf.mxu0  ;;  %v403_v42 = vpop.f32.mrf.mxu1 }
  0xa3   :  { %v364_v43 = vadd.f32 %v964_v40, %v363_v41  ;;  %v404_v44 = vadd.f32 %v964_v40, %v403_v42 }
  0xa5   :  { %v523_v45 = vmax.f32 %v364_v43, 0.0  ;;  %v539_v46 = vmax.f32 %v404_v44, 0.0 }
  0xa7   :  { %588 = vst.msk [vmem:[%s1289_s3] sm:$0xff] %vm587_vm0, %v523_v45 }
  0xa8   :  { %604 = vst.msk [vmem:[%s1289_s3 + $0x80] sm:$0xff] %vm587_vm0, %v539_v46 }
  0xa9   :  { %v443_v47 = vpop.f32.mrf.mxu2  ;;  %v483_v48 = vpop.f32.mrf.mxu3 }
  0xaa   :  { %v444_v49 = vadd.f32 %v964_v40, %v443_v47  ;;  %v484_v50 = vadd.f32 %v964_v40, %v483_v48  ;;  %v365_v51 = vpop.f32.mrf.mxu0  ;;  %v405_v52 = vpop.f32.mrf.mxu1 }
  0xab   :  { %v366_v53 = vadd.f32 %v964_v40, %v365_v51  ;;  %v406_v54 = vadd.f32 %v964_v40, %v405_v52 }
  0xac   :  { %v555_v55 = vmax.f32 %v444_v49, 0.0  ;;  %v571_v56 = vmax.f32 %v484_v50, 0.0 }
  0xad   :  { %v524_v57 = vmax.f32 %v366_v53, 0.0  ;;  %v540_v58 = vmax.f32 %v406_v54, 0.0 }
  0xae   :  { %620 = vst.msk [vmem:[%s1289_s3 + $0x100] sm:$0xff] %vm587_vm0, %v555_v55 }
  0xaf   :  { %636 = vst.msk [vmem:[%s1289_s3 + $0x180] sm:$0xff] %vm587_vm0, %v571_v56 }
  0xb0   :  { %589 = vst.msk [vmem:[%s1289_s3 + $0x8] sm:$0xff] %vm587_vm0, %v524_v57 }
  0xb1   :  { %605 = vst.msk [vmem:[%s1289_s3 + $0x88] sm:$0xff] %vm587_vm0, %v540_v58  ;;  %v445_v59 = vpop.f32.mrf.mxu2  ;;  %v485_v60 = vpop.f32.mrf.mxu3 }
  0xb2   :  { %v446_v61 = vadd.f32 %v964_v40, %v445_v59  ;;  %v486_v62 = vadd.f32 %v964_v40, %v485_v60  ;;  %v368_v63 = vpop.f32.mrf.mxu0  ;;  %v408_v0 = vpop.f32.mrf.mxu1 }
  0xb3   :  { %v369_v1 = vadd.f32 %v964_v40, %v368_v63  ;;  %v409_v2 = vadd.f32 %v964_v40, %v408_v0 }
  0xb4   :  { %v556_v3 = vmax.f32 %v446_v61, 0.0  ;;  %v572_v4 = vmax.f32 %v486_v62, 0.0 }
  0xb5   :  { %v525_v5 = vmax.f32 %v369_v1, 0.0  ;;  %v541_v6 = vmax.f32 %v409_v2, 0.0 }
  0xb6   :  { %621 = vst.msk [vmem:[%s1289_s3 + $0x108] sm:$0xff] %vm587_vm0, %v556_v3 }
  0xb7   :  { %637 = vst.msk [vmem:[%s1289_s3 + $0x188] sm:$0xff] %vm587_vm0, %v572_v4 }
  0xb8   :  { %590 = vst.msk [vmem:[%s1289_s3 + $0x10] sm:$0xff] %vm587_vm0, %v525_v5 }
  0xb9   :  { %606 = vst.msk [vmem:[%s1289_s3 + $0x90] sm:$0xff] %vm587_vm0, %v541_v6  ;;  %v448_v7 = vpop.f32.mrf.mxu2  ;;  %v488_v8 = vpop.f32.mrf.mxu3 }
  0xba   :  { %v449_v9 = vadd.f32 %v964_v40, %v448_v7  ;;  %v489_v10 = vadd.f32 %v964_v40, %v488_v8  ;;  %v370_v11 = vpop.f32.mrf.mxu0  ;;  %v410_v12 = vpop.f32.mrf.mxu1 }
  0xbb   :  { %v371_v13 = vadd.f32 %v964_v40, %v370_v11  ;;  %v411_v14 = vadd.f32 %v964_v40, %v410_v12 }
  0xbc   :  { %v557_v15 = vmax.f32 %v449_v9, 0.0  ;;  %v573_v16 = vmax.f32 %v489_v10, 0.0 }
  0xbd   :  { %v526_v17 = vmax.f32 %v371_v13, 0.0  ;;  %v542_v18 = vmax.f32 %v411_v14, 0.0 }
  0xbe   :  { %622 = vst.msk [vmem:[%s1289_s3 + $0x110] sm:$0xff] %vm587_vm0, %v557_v15 }
  0xbf   :  { %638 = vst.msk [vmem:[%s1289_s3 + $0x190] sm:$0xff] %vm587_vm0, %v573_v16 }
  0xc0   :  { %591 = vst.msk [vmem:[%s1289_s3 + $0x18] sm:$0xff] %vm587_vm0, %v526_v17 }
  0xc1   :  { %607 = vst.msk [vmem:[%s1289_s3 + $0x98] sm:$0xff] %vm587_vm0, %v542_v18  ;;  %v450_v19 = vpop.f32.mrf.mxu2  ;;  %v490_v20 = vpop.f32.mrf.mxu3 }
  0xc2   :  { %v451_v21 = vadd.f32 %v964_v40, %v450_v19  ;;  %v491_v22 = vadd.f32 %v964_v40, %v490_v20  ;;  %v373_v23 = vpop.f32.mrf.mxu0  ;;  %v413_v24 = vpop.f32.mrf.mxu1 }
  0xc3   :  { %v374_v25 = vadd.f32 %v964_v40, %v373_v23  ;;  %v414_v26 = vadd.f32 %v964_v40, %v413_v24 }
  0xc4   :  { %v558_v27 = vmax.f32 %v451_v21, 0.0  ;;  %v574_v28 = vmax.f32 %v491_v22, 0.0 }
  0xc5   :  { %v527_v29 = vmax.f32 %v374_v25, 0.0  ;;  %v543_v30 = vmax.f32 %v414_v26, 0.0 }
  0xc6   :  { %623 = vst.msk [vmem:[%s1289_s3 + $0x118] sm:$0xff] %vm587_vm0, %v558_v27 }
  0xc7   :  { %639 = vst.msk [vmem:[%s1289_s3 + $0x198] sm:$0xff] %vm587_vm0, %v574_v28 }
  0xc8   :  { %592 = vst.msk [vmem:[%s1289_s3 + $0x20] sm:$0xff] %vm587_vm0, %v527_v29 }
  0xc9   :  { %608 = vst.msk [vmem:[%s1289_s3 + $0xa0] sm:$0xff] %vm587_vm0, %v543_v30  ;;  %v453_v31 = vpop.f32.mrf.mxu2  ;;  %v493_v32 = vpop.f32.mrf.mxu3 }
  0xca   :  { %v454_v33 = vadd.f32 %v964_v40, %v453_v31  ;;  %v494_v34 = vadd.f32 %v964_v40, %v493_v32  ;;  %v375_v35 = vpop.f32.mrf.mxu0  ;;  %v415_v36 = vpop.f32.mrf.mxu1 }
  0xcb   :  { %v376_v37 = vadd.f32 %v964_v40, %v375_v35  ;;  %v416_v38 = vadd.f32 %v964_v40, %v415_v36 }
  0xcc   :  { %v559_v39 = vmax.f32 %v454_v33, 0.0  ;;  %v575_v41 = vmax.f32 %v494_v34, 0.0 }
  0xcd   :  { %v528_v42 = vmax.f32 %v376_v37, 0.0  ;;  %v544_v43 = vmax.f32 %v416_v38, 0.0 }
  0xce   :  { %624 = vst.msk [vmem:[%s1289_s3 + $0x120] sm:$0xff] %vm587_vm0, %v559_v39 }
  0xcf   :  { %640 = vst.msk [vmem:[%s1289_s3 + $0x1a0] sm:$0xff] %vm587_vm0, %v575_v41 }
  0xd0   :  { %593 = vst.msk [vmem:[%s1289_s3 + $0x28] sm:$0xff] %vm587_vm0, %v528_v42 }
  0xd1   :  { %609 = vst.msk [vmem:[%s1289_s3 + $0xa8] sm:$0xff] %vm587_vm0, %v544_v43  ;;  %v455_v44 = vpop.f32.mrf.mxu2  ;;  %v495_v45 = vpop.f32.mrf.mxu3 }
  0xd2   :  { %v456_v46 = vadd.f32 %v964_v40, %v455_v44  ;;  %v496_v47 = vadd.f32 %v964_v40, %v495_v45  ;;  %v378_v48 = vpop.f32.mrf.mxu0  ;;  %v418_v49 = vpop.f32.mrf.mxu1 }
  0xd3   :  { %v379_v50 = vadd.f32 %v964_v40, %v378_v48  ;;  %v419_v51 = vadd.f32 %v964_v40, %v418_v49 }
  0xd4   :  { %v560_v52 = vmax.f32 %v456_v46, 0.0  ;;  %v576_v53 = vmax.f32 %v496_v47, 0.0 }
  0xd5   :  { %v529_v54 = vmax.f32 %v379_v50, 0.0  ;;  %v545_v55 = vmax.f32 %v419_v51, 0.0 }
  0xd6   :  { %625 = vst.msk [vmem:[%s1289_s3 + $0x128] sm:$0xff] %vm587_vm0, %v560_v52 }
  0xd7   :  { %641 = vst.msk [vmem:[%s1289_s3 + $0x1a8] sm:$0xff] %vm587_vm0, %v576_v53 }
  0xd8   :  { %594 = vst.msk [vmem:[%s1289_s3 + $0x30] sm:$0xff] %vm587_vm0, %v529_v54 }
  0xd9   :  { %610 = vst.msk [vmem:[%s1289_s3 + $0xb0] sm:$0xff] %vm587_vm0, %v545_v55  ;;  %v458_v56 = vpop.f32.mrf.mxu2  ;;  %v498_v57 = vpop.f32.mrf.mxu3 }
  0xda   :  { %v459_v58 = vadd.f32 %v964_v40, %v458_v56  ;;  %v499_v59 = vadd.f32 %v964_v40, %v498_v57  ;;  %v380_v60 = vpop.f32.mrf.mxu0  ;;  %v420_v61 = vpop.f32.mrf.mxu1 }
  0xdb   :  { %v381_v62 = vadd.f32 %v964_v40, %v380_v60  ;;  %v421_v63 = vadd.f32 %v964_v40, %v420_v61 }
  0xdc   :  { %v561_v0 = vmax.f32 %v459_v58, 0.0  ;;  %v577_v1 = vmax.f32 %v499_v59, 0.0 }
  0xdd   :  { %v530_v2 = vmax.f32 %v381_v62, 0.0  ;;  %v546_v3 = vmax.f32 %v421_v63, 0.0 }
  0xde   :  { %626 = vst.msk [vmem:[%s1289_s3 + $0x130] sm:$0xff] %vm587_vm0, %v561_v0 }
  0xdf   :  { %642 = vst.msk [vmem:[%s1289_s3 + $0x1b0] sm:$0xff] %vm587_vm0, %v577_v1 }
  0xe0   :  { %595 = vst.msk [vmem:[%s1289_s3 + $0x38] sm:$0xff] %vm587_vm0, %v530_v2 }
  0xe1   :  { %611 = vst.msk [vmem:[%s1289_s3 + $0xb8] sm:$0xff] %vm587_vm0, %v546_v3  ;;  %v460_v4 = vpop.f32.mrf.mxu2  ;;  %v500_v5 = vpop.f32.mrf.mxu3 }
  0xe2   :  { %v461_v6 = vadd.f32 %v964_v40, %v460_v4  ;;  %v501_v7 = vadd.f32 %v964_v40, %v500_v5  ;;  %v383_v8 = vpop.f32.mrf.mxu0  ;;  %v423_v9 = vpop.f32.mrf.mxu1 }
  0xe3   :  { %v384_v10 = vadd.f32 %v964_v40, %v383_v8  ;;  %v424_v11 = vadd.f32 %v964_v40, %v423_v9 }
  0xe4   :  { %v562_v12 = vmax.f32 %v461_v6, 0.0  ;;  %v578_v13 = vmax.f32 %v501_v7, 0.0 }
  0xe5   :  { %v531_v14 = vmax.f32 %v384_v10, 0.0  ;;  %v547_v15 = vmax.f32 %v424_v11, 0.0 }
  0xe6   :  { %627 = vst.msk [vmem:[%s1289_s3 + $0x138] sm:$0xff] %vm587_vm0, %v562_v12 }
  0xe7   :  { %643 = vst.msk [vmem:[%s1289_s3 + $0x1b8] sm:$0xff] %vm587_vm0, %v578_v13 }
  0xe8   :  { %596 = vst.msk [vmem:[%s1289_s3 + $0x40] sm:$0xff] %vm587_vm0, %v531_v14 }
  0xe9   :  { %612 = vst.msk [vmem:[%s1289_s3 + $0xc0] sm:$0xff] %vm587_vm0, %v547_v15  ;;  %v463_v16 = vpop.f32.mrf.mxu2  ;;  %v503_v17 = vpop.f32.mrf.mxu3 }
  0xea   :  { %v464_v18 = vadd.f32 %v964_v40, %v463_v16  ;;  %v504_v19 = vadd.f32 %v964_v40, %v503_v17  ;;  %v385_v20 = vpop.f32.mrf.mxu0  ;;  %v425_v21 = vpop.f32.mrf.mxu1 }
  0xeb   :  { %v386_v22 = vadd.f32 %v964_v40, %v385_v20  ;;  %v426_v23 = vadd.f32 %v964_v40, %v425_v21 }
  0xec   :  { %v563_v24 = vmax.f32 %v464_v18, 0.0  ;;  %v579_v25 = vmax.f32 %v504_v19, 0.0 }
  0xed   :  { %v532_v26 = vmax.f32 %v386_v22, 0.0  ;;  %v548_v27 = vmax.f32 %v426_v23, 0.0 }
  0xee   :  { %628 = vst.msk [vmem:[%s1289_s3 + $0x140] sm:$0xff] %vm587_vm0, %v563_v24 }
  0xef   :  { %644 = vst.msk [vmem:[%s1289_s3 + $0x1c0] sm:$0xff] %vm587_vm0, %v579_v25 }
  0xf0   :  { %597 = vst.msk [vmem:[%s1289_s3 + $0x48] sm:$0xff] %vm587_vm0, %v532_v26 }
  0xf1   :  { %613 = vst.msk [vmem:[%s1289_s3 + $0xc8] sm:$0xff] %vm587_vm0, %v548_v27  ;;  %v465_v28 = vpop.f32.mrf.mxu2  ;;  %v505_v29 = vpop.f32.mrf.mxu3 }
  0xf2   :  { %v466_v30 = vadd.f32 %v964_v40, %v465_v28  ;;  %v506_v31 = vadd.f32 %v964_v40, %v505_v29  ;;  %v388_v32 = vpop.f32.mrf.mxu0  ;;  %v428_v33 = vpop.f32.mrf.mxu1 }
  0xf3   :  { %v389_v34 = vadd.f32 %v964_v40, %v388_v32  ;;  %v429_v35 = vadd.f32 %v964_v40, %v428_v33 }
  0xf4   :  { %v564_v36 = vmax.f32 %v466_v30, 0.0  ;;  %v580_v37 = vmax.f32 %v506_v31, 0.0 }
  0xf5   :  { %v533_v38 = vmax.f32 %v389_v34, 0.0  ;;  %v549_v39 = vmax.f32 %v429_v35, 0.0 }
  0xf6   :  { %629 = vst.msk [vmem:[%s1289_s3 + $0x148] sm:$0xff] %vm587_vm0, %v564_v36 }
  0xf7   :  { %645 = vst.msk [vmem:[%s1289_s3 + $0x1c8] sm:$0xff] %vm587_vm0, %v580_v37 }
  0xf8   :  { %598 = vst.msk [vmem:[%s1289_s3 + $0x50] sm:$0xff] %vm587_vm0, %v533_v38 }
  0xf9   :  { %614 = vst.msk [vmem:[%s1289_s3 + $0xd0] sm:$0xff] %vm587_vm0, %v549_v39  ;;  %v468_v41 = vpop.f32.mrf.mxu2  ;;  %v508_v42 = vpop.f32.mrf.mxu3 }
  0xfa   :  { %v469_v43 = vadd.f32 %v964_v40, %v468_v41  ;;  %v509_v44 = vadd.f32 %v964_v40, %v508_v42  ;;  %v390_v45 = vpop.f32.mrf.mxu0  ;;  %v430_v46 = vpop.f32.mrf.mxu1 }
  0xfb   :  { %v391_v47 = vadd.f32 %v964_v40, %v390_v45  ;;  %v431_v48 = vadd.f32 %v964_v40, %v430_v46 }
  0xfc   :  { %v565_v49 = vmax.f32 %v469_v43, 0.0  ;;  %v581_v50 = vmax.f32 %v509_v44, 0.0 }
  0xfd   :  { %v534_v51 = vmax.f32 %v391_v47, 0.0  ;;  %v550_v52 = vmax.f32 %v431_v48, 0.0 }
  0xfe   :  { %630 = vst.msk [vmem:[%s1289_s3 + $0x150] sm:$0xff] %vm587_vm0, %v565_v49 }
  0xff   :  { %646 = vst.msk [vmem:[%s1289_s3 + $0x1d0] sm:$0xff] %vm587_vm0, %v581_v50 }
 0x100   :  { %599 = vst.msk [vmem:[%s1289_s3 + $0x58] sm:$0xff] %vm587_vm0, %v534_v51 }
 0x101   :  { %615 = vst.msk [vmem:[%s1289_s3 + $0xd8] sm:$0xff] %vm587_vm0, %v550_v52  ;;  %v470_v53 = vpop.f32.mrf.mxu2  ;;  %v510_v54 = vpop.f32.mrf.mxu3 }
 0x102   :  { %v471_v55 = vadd.f32 %v964_v40, %v470_v53  ;;  %v511_v56 = vadd.f32 %v964_v40, %v510_v54  ;;  %v393_v57 = vpop.f32.mrf.mxu0  ;;  %v433_v58 = vpop.f32.mrf.mxu1 }
 0x103   :  { %v394_v59 = vadd.f32 %v964_v40, %v393_v57  ;;  %v434_v60 = vadd.f32 %v964_v40, %v433_v58 }
 0x104   :  { %v566_v61 = vmax.f32 %v471_v55, 0.0  ;;  %v582_v62 = vmax.f32 %v511_v56, 0.0 }
 0x105   :  { %v535_v63 = vmax.f32 %v394_v59, 0.0  ;;  %v551_v0 = vmax.f32 %v434_v60, 0.0 }
 0x106   :  { %631 = vst.msk [vmem:[%s1289_s3 + $0x158] sm:$0xff] %vm587_vm0, %v566_v61 }
 0x107   :  { %647 = vst.msk [vmem:[%s1289_s3 + $0x1d8] sm:$0xff] %vm587_vm0, %v582_v62 }
 0x108   :  { %600 = vst.msk [vmem:[%s1289_s3 + $0x60] sm:$0xff] %vm587_vm0, %v535_v63 }
 0x109   :  { %616 = vst.msk [vmem:[%s1289_s3 + $0xe0] sm:$0xff] %vm587_vm0, %v551_v0  ;;  %v473_v1 = vpop.f32.mrf.mxu2  ;;  %v513_v2 = vpop.f32.mrf.mxu3 }
 0x10a   :  { %v474_v3 = vadd.f32 %v964_v40, %v473_v1  ;;  %v514_v4 = vadd.f32 %v964_v40, %v513_v2  ;;  %v395_v5 = vpop.f32.mrf.mxu0  ;;  %v435_v6 = vpop.f32.mrf.mxu1 }
 0x10b   :  { %v396_v7 = vadd.f32 %v964_v40, %v395_v5  ;;  %v436_v8 = vadd.f32 %v964_v40, %v435_v6 }
 0x10c   :  { %v567_v9 = vmax.f32 %v474_v3, 0.0  ;;  %v583_v10 = vmax.f32 %v514_v4, 0.0 }
 0x10d   :  { %v536_v11 = vmax.f32 %v396_v7, 0.0  ;;  %v552_v12 = vmax.f32 %v436_v8, 0.0 }
 0x10e   :  { %632 = vst.msk [vmem:[%s1289_s3 + $0x160] sm:$0xff] %vm587_vm0, %v567_v9 }
 0x10f   :  { %648 = vst.msk [vmem:[%s1289_s3 + $0x1e0] sm:$0xff] %vm587_vm0, %v583_v10 }
 0x110   :  { %601 = vst.msk [vmem:[%s1289_s3 + $0x68] sm:$0xff] %vm587_vm0, %v536_v11 }
 0x111   :  { %617 = vst.msk [vmem:[%s1289_s3 + $0xe8] sm:$0xff] %vm587_vm0, %v552_v12  ;;  %v475_v13 = vpop.f32.mrf.mxu2  ;;  %v515_v14 = vpop.f32.mrf.mxu3 }
 0x112   :  { %v476_v15 = vadd.f32 %v964_v40, %v475_v13  ;;  %v516_v16 = vadd.f32 %v964_v40, %v515_v14  ;;  %v398_v17 = vpop.f32.mrf.mxu0  ;;  %v438_v18 = vpop.f32.mrf.mxu1 }
 0x113   :  { %v399_v19 = vadd.f32 %v964_v40, %v398_v17  ;;  %v439_v20 = vadd.f32 %v964_v40, %v438_v18 }
 0x114   :  { %v568_v21 = vmax.f32 %v476_v15, 0.0  ;;  %v584_v22 = vmax.f32 %v516_v16, 0.0 }
 0x115   :  { %v537_v23 = vmax.f32 %v399_v19, 0.0  ;;  %v553_v24 = vmax.f32 %v439_v20, 0.0 }
 0x116   :  { %633 = vst.msk [vmem:[%s1289_s3 + $0x168] sm:$0xff] %vm587_vm0, %v568_v21 }
 0x117   :  { %649 = vst.msk [vmem:[%s1289_s3 + $0x1e8] sm:$0xff] %vm587_vm0, %v584_v22 }
 0x118   :  { %602 = vst.msk [vmem:[%s1289_s3 + $0x70] sm:$0xff] %vm587_vm0, %v537_v23 }
 0x119   :  { %618 = vst.msk [vmem:[%s1289_s3 + $0xf0] sm:$0xff] %vm587_vm0, %v553_v24  ;;  %v478_v25 = vpop.f32.mrf.mxu2  ;;  %v518_v26 = vpop.f32.mrf.mxu3 }
 0x11a   :  { %v479_v27 = vadd.f32 %v964_v40, %v478_v25  ;;  %v519_v28 = vadd.f32 %v964_v40, %v518_v26  ;;  %v400_v29 = vpop.f32.mrf.mxu0  ;;  %v440_v30 = vpop.f32.mrf.mxu1 }
 0x11b   :  { %v401_v31 = vadd.f32 %v964_v40, %v400_v29  ;;  %v441_v32 = vadd.f32 %v964_v40, %v440_v30 }
 0x11c   :  { %v569_v33 = vmax.f32 %v479_v27, 0.0  ;;  %v585_v34 = vmax.f32 %v519_v28, 0.0 }
 0x11d   :  { %v538_v35 = vmax.f32 %v401_v31, 0.0  ;;  %v554_v36 = vmax.f32 %v441_v32, 0.0 }
 0x11e   :  { %634 = vst.msk [vmem:[%s1289_s3 + $0x170] sm:$0xff] %vm587_vm0, %v569_v33 }
 0x11f   :  { %650 = vst.msk [vmem:[%s1289_s3 + $0x1f0] sm:$0xff] %vm587_vm0, %v585_v34 }
 0x120   :  { %603 = vst.msk [vmem:[%s1289_s3 + $0x78] sm:$0xff] %vm587_vm0, %v538_v35 }
 0x121   :  { %619 = vst.msk [vmem:[%s1289_s3 + $0xf8] sm:$0xff] %vm587_vm0, %v554_v36  ;;  %v480_v37 = vpop.f32.mrf.mxu2  ;;  %v520_v38 = vpop.f32.mrf.mxu3 }
 0x122   :  { %v481_v39 = vadd.f32 %v964_v40, %v480_v37  ;;  %v521_v41 = vadd.f32 %v964_v40, %v520_v38 }
 0x124   :  { %v570_v42 = vmax.f32 %v481_v39, 0.0  ;;  %v586_v43 = vmax.f32 %v521_v41, 0.0 }
 0x126   :  { %635 = vst.msk [vmem:[%s1289_s3 + $0x178] sm:$0xff] %vm587_vm0, %v570_v42 }
 0x127   :  { %651 = vst.msk [vmem:[%s1289_s3 + $0x1f8] sm:$0xff] %vm587_vm0, %v586_v43 }
 0x128   :  { %656 = vsyncpa [#allocation3], 1 }

</bundles_post_ra>
